<compile_context>
chip_gen: v6e
topology: v6e:2x2x1
jax: 0.10.0
libtpu: 0.0.40
codegen_flags: <defaults>
</compile_context>

<pallas_src>
import functools
import math

import jax
import jax.numpy as jnp
from jax.experimental import pallas as pl
from jax.experimental.pallas import tpu as pltpu


# ----------------------------------------------------------------------------
# Kernels
# ----------------------------------------------------------------------------
def _bifpn_flat_kernel(w_ref, x0_ref, x1_ref, o_ref, *, nb0, eps):
    """Lane-dense fused scale+concat on flattened per-batch slabs.

    w_ref : (3,) f32 in SMEM (scalar reads)
    x0_ref: (N, T) VMEM tile of input 0's flat slab
    x1_ref: (N, T) VMEM tile of input 1's flat slab
    o_ref : (N, T) VMEM tile of the output's flat slab
    Grid axis 0 walks output column tiles: tiles [0, nb0) are the x0 half,
    the rest the x1 half.
    """
    # Hoisted scalar normalisation — exactly the reference's w/(sum(w)+eps).
    denom = w_ref[0] + w_ref[1] + w_ref[2] + eps
    s0 = (w_ref[0] / denom).astype(o_ref.dtype)
    s1 = (w_ref[1] / denom).astype(o_ref.dtype)

    j = pl.program_id(0)

    @pl.when(j < nb0)
    def _():
        o_ref[...] = x0_ref[...] * s0

    @pl.when(j >= nb0)
    def _():
        o_ref[...] = x1_ref[...] * s1


def _bifpn_nchw_kernel(w_ref, x0_ref, x1_ref, o_ref, *, c0, eps):
    """Fallback: channel-structured scale+concat (full-extent blocks).

    x0_ref: (c0, hw), x1_ref: (c1, hw), o_ref: (c0+c1, hw)
    """
    denom = w_ref[0] + w_ref[1] + w_ref[2] + eps
    s0 = (w_ref[0] / denom).astype(o_ref.dtype)
    s1 = (w_ref[1] / denom).astype(o_ref.dtype)
    o_ref[:c0, :] = x0_ref[...] * s0
    o_ref[c0:, :] = x1_ref[...] * s1


# ----------------------------------------------------------------------------
# Wrapper
# ----------------------------------------------------------------------------
def _pick_flat_tile(m0, m1, n_rows, itemsize, max_bytes=2 << 20):
    """Largest multiple-of-128 column tile dividing both flat slab widths,
    capped by a per-tile byte budget (keeps 2x(x0+x1+out) tiles << 32 MiB).
    Returns None when no 128-aligned tile exists (caller falls back)."""
    g = math.gcd(m0, m1)
    if g % 128 != 0:
        return None
    base = g // 128
    row_bytes = max(1, n_rows * itemsize)
    best = 128
    for d in range(1, base + 1):
        if base % d == 0 and (128 * d) * row_bytes <= max_bytes:
            best = 128 * d
    return best


def concat_bifpn_forward(x, w, dimension=1, epsilon=1e-4):
    """x: [x0, x1] in NCHW; w: (3,) learnable fusion weights (f32)."""
    assert dimension == 1, "Concat_BiFPN kernel implements channel (dim=1) concat"
    x0, x1 = x[0], x[1]
    assert x0.dtype == x1.dtype, "inputs must share a dtype"
    n, c0, h, wd = x0.shape
    n1, c1, h1, w1_ = x1.shape
    assert (n, h, wd) == (n1, h1, w1_), "inputs must match on batch/spatial dims"

    hw = h * wd
    m0, m1 = c0 * hw, c1 * hw
    itemsize = jnp.dtype(x0.dtype).itemsize

    # Pure streaming kernel: read both inputs once, write output once.
    total_bytes = (x0.size + x1.size) * itemsize
    cost = pl.CostEstimate(flops=x0.size + x1.size, transcendentals=0,
                           bytes_accessed=2 * total_bytes)
    cparams = pltpu.CompilerParams(
        dimension_semantics=("parallel",),
        vmem_limit_bytes=32 * 1024 * 1024)

    t = _pick_flat_tile(m0, m1, n, itemsize)
    if t is not None:
        # Flat, lane-dense path.  Flattening trailing contiguous dims; any
        # relayout XLA might insert is a straight bitcast of row-major data.
        nb0, nb1 = m0 // t, m1 // t
        x0f = x0.reshape(n, m0)
        x1f = x1.reshape(n, m1)
        out = pl.pallas_call(
            functools.partial(_bifpn_flat_kernel, nb0=nb0, eps=float(epsilon)),
            out_shape=jax.ShapeDtypeStruct((n, m0 + m1), x0.dtype),
            grid=(nb0 + nb1,),
            in_specs=[
                # 3-element fusion weights -> SMEM, read as scalars in-kernel.
                pl.BlockSpec(memory_space=pltpu.MemorySpace.SMEM),
                # "Idle" input stalls on its last/first block -> no extra DMA.
                pl.BlockSpec((n, t), lambda j: (0, jnp.minimum(j, nb0 - 1))),
                pl.BlockSpec((n, t), lambda j: (0, jnp.maximum(j - nb0, 0))),
            ],
            out_specs=pl.BlockSpec((n, t), lambda j: (0, j)),
            compiler_params=cparams,
            cost_estimate=cost,
        )(w, x0f, x1f)
        return out.reshape(n, c0 + c1, h, wd)

    # Fallback: spatial size with no 128-aligned flat tiling (e.g. 5x5, 20x20).
    # Full-extent blocks in the last two dims are always legal.
    out = pl.pallas_call(
        functools.partial(_bifpn_nchw_kernel, c0=c0, eps=float(epsilon)),
        out_shape=jax.ShapeDtypeStruct((n, c0 + c1, hw), x0.dtype),
        grid=(n,),
        in_specs=[
            pl.BlockSpec(memory_space=pltpu.MemorySpace.SMEM),
            pl.BlockSpec((None, c0, hw), lambda i: (i, 0, 0)),
            pl.BlockSpec((None, c1, hw), lambda i: (i, 0, 0)),
        ],
        out_specs=pl.BlockSpec((None, c0 + c1, hw), lambda i: (i, 0, 0)),
        compiler_params=cparams,
        cost_estimate=cost,
    )(w, x0.reshape(n, c0, hw), x1.reshape(n, c1, hw))
    return out.reshape(n, c0 + c1, h, wd)


# ----------------------------------------------------------------------------
# Pure-JAX reference (mirrors the PyTorch forward)
# ----------------------------------------------------------------------------
def ref_forward(x, w, epsilon=1e-4):
    weight = w / (jnp.sum(w) + epsilon)
    return jnp.concatenate([weight[0] * x[0], weight[1] * x[1]], axis=1)


if __name__ == "__main__":
    key = jax.random.PRNGKey(0)
    k0, k1, kw, k2, k3 = jax.random.split(key, 5)

    # Primary (lane-dense flat) path: (2, 4, 16, 16) + (2, 4, 16, 16) -> (2, 8, 16, 16)
    N, C0, C1, H, W = 2, 4, 4, 16, 16
    x0 = jax.random.normal(k0, (N, C0, H, W), jnp.float32)
    x1 = jax.random.normal(k1, (N, C1, H, W), jnp.float32)
    # nn.Parameter(torch.ones(3)) at init; perturb slightly so the test is nontrivial.
    w = jnp.ones((3,), jnp.float32) + 0.25 * jax.random.uniform(kw, (3,), jnp.float32)

    out = jax.block_until_ready(jax.jit(concat_bifpn_forward)([x0, x1], w))
    ref = jax.block_until_ready(ref_forward([x0, x1], w))
    assert out.shape == (N, C0 + C1, H, W), out.shape
    assert jnp.allclose(out, ref, atol=1e-5, rtol=1e-5), float(jnp.max(jnp.abs(out - ref)))

    # Fallback (odd spatial) path: 5x5 BiFPN level.
    y0 = jax.random.normal(k2, (N, C0, 5, 5), jnp.float32)
    y1 = jax.random.normal(k3, (N, C1, 5, 5), jnp.float32)
    out2 = jax.block_until_ready(jax.jit(concat_bifpn_forward)([y0, y1], w))
    ref2 = jax.block_until_ready(ref_forward([y0, y1], w))
    assert out2.shape == (N, C0 + C1, 5, 5), out2.shape
    assert jnp.allclose(out2, ref2, atol=1e-5, rtol=1e-5), float(jnp.max(jnp.abs(out2 - ref2)))

    print("KERNEL_OK")
</pallas_src>

<mosaic_0001>
module attributes {stable_mosaic.version = 11 : i64} {
  func.func @_bifpn_flat_kernel(%arg0: i32, %arg1: memref<3xf32, #tpu.memory_space<smem>>, %arg2: memref<2x1024xf32, #tpu.memory_space<vmem>>, %arg3: memref<2x1024xf32, #tpu.memory_space<vmem>>, %arg4: memref<2x1024xf32, #tpu.memory_space<vmem>>) attributes {dimension_semantics = [#tpu.dimension_semantics<parallel>], iteration_bounds = array<i64: 2>, scalar_prefetch = 0 : i64, scratch_operands = 0 : i64, tpu.core_type = #tpu.core_type<tc>, window_params = [{transform_indices = @transform_0, window_bounds = array<i64: 3>}, {transform_indices = @transform_1, window_bounds = array<i64: 2, 1024>}, {transform_indices = @transform_2, window_bounds = array<i64: 2, 1024>}, {transform_indices = @transform_3, window_bounds = array<i64: 2, 1024>}]} {
    %c0 = arith.constant 0 : index
    %0 = memref.load %arg1[%c0] : memref<3xf32, #tpu.memory_space<smem>>
    %c1 = arith.constant 1 : index
    %1 = memref.load %arg1[%c1] : memref<3xf32, #tpu.memory_space<smem>>
    %2 = arith.addf %0, %1 : f32
    %c2 = arith.constant 2 : index
    %3 = memref.load %arg1[%c2] : memref<3xf32, #tpu.memory_space<smem>>
    %4 = arith.addf %2, %3 : f32
    %cst = arith.constant 9.99999974E-5 : f32
    %5 = arith.addf %4, %cst : f32
    %c0_0 = arith.constant 0 : index
    %6 = memref.load %arg1[%c0_0] : memref<3xf32, #tpu.memory_space<smem>>
    %7 = arith.divf %6, %5 : f32
    %c1_1 = arith.constant 1 : index
    %8 = memref.load %arg1[%c1_1] : memref<3xf32, #tpu.memory_space<smem>>
    %9 = arith.divf %8, %5 : f32
    %c1_i32 = arith.constant 1 : i32
    %10 = arith.cmpi slt, %arg0, %c1_i32 : i32
    %11 = arith.extui %10 : i1 to i32
    %c0_i32 = arith.constant 0 : i32
    %12 = arith.cmpi ne, %11, %c0_i32 : i32
    scf.if %12 {
      %c0_4 = arith.constant 0 : index
      %c0_5 = arith.constant 0 : index
      %16 = vector.load %arg2[%c0_4, %c0_5] : memref<2x1024xf32, #tpu.memory_space<vmem>>, vector<2x1024xf32>
      %17 = vector.broadcast %7 : f32 to vector<2x1024xf32>
      %18 = arith.mulf %16, %17 : vector<2x1024xf32>
      %c0_6 = arith.constant 0 : index
      %c0_7 = arith.constant 0 : index
      %19 = vector.load %arg4[%c0_6, %c0_7] : memref<2x1024xf32, #tpu.memory_space<vmem>>, vector<2x1024xf32>
      tpu.vector_store %arg4[%c0_6, %c0_7], %18 {strides = array<i32>} : memref<2x1024xf32, #tpu.memory_space<vmem>>, vector<2x1024xf32>,
    } else {
    }
    %c1_i32_2 = arith.constant 1 : i32
    %13 = arith.cmpi sge, %arg0, %c1_i32_2 : i32
    %14 = arith.extui %13 : i1 to i32
    %c0_i32_3 = arith.constant 0 : i32
    %15 = arith.cmpi ne, %14, %c0_i32_3 : i32
    scf.if %15 {
      %c0_4 = arith.constant 0 : index
      %c0_5 = arith.constant 0 : index
      %16 = vector.load %arg3[%c0_4, %c0_5] : memref<2x1024xf32, #tpu.memory_space<vmem>>, vector<2x1024xf32>
      %17 = vector.broadcast %9 : f32 to vector<2x1024xf32>
      %18 = arith.mulf %16, %17 : vector<2x1024xf32>
      %c0_6 = arith.constant 0 : index
      %c0_7 = arith.constant 0 : index
      %19 = vector.load %arg4[%c0_6, %c0_7] : memref<2x1024xf32, #tpu.memory_space<vmem>>, vector<2x1024xf32>
      tpu.vector_store %arg4[%c0_6, %c0_7], %18 {strides = array<i32>} : memref<2x1024xf32, #tpu.memory_space<vmem>>, vector<2x1024xf32>,
    } else {
    }
    return
  }
  func.func @transform_0(%arg0: i32) -> i32 {
    %c0_i32 = arith.constant 0 : i32
    %c0_i32_0 = arith.constant 0 : i32
    return %c0_i32 : i32
  }
  func.func @transform_1(%arg0: i32) -> (i32, i32) {
    %c0_i32 = arith.constant 0 : i32
    %0 = arith.minsi %arg0, %c0_i32 : i32
    %c0_i32_0 = arith.constant 0 : i32
    %c0_i32_1 = arith.constant 0 : i32
    return %c0_i32_0, %0 : i32, i32
  }
  func.func @transform_2(%arg0: i32) -> (i32, i32) {
    %c1_i32 = arith.constant 1 : i32
    %0 = arith.subi %arg0, %c1_i32 : i32
    %c0_i32 = arith.constant 0 : i32
    %1 = arith.maxsi %0, %c0_i32 : i32
    %c0_i32_0 = arith.constant 0 : i32
    %c0_i32_1 = arith.constant 0 : i32
    return %c0_i32_0, %1 : i32, i32
  }
  func.func @transform_3(%arg0: i32) -> (i32, i32) {
    %c0_i32 = arith.constant 0 : i32
    %c0_i32_0 = arith.constant 0 : i32
    return %c0_i32, %arg0 : i32, i32
  }
}

</mosaic_0001>

<bundles_post_ra>
// kernel: concat_bifpn_forward.1
= control target key start
LH: loop header
LB: loop body
LE: loop exit
PB: predicated region body
PF: predicated region fallthrough
CT: control target
= control target key end

     0   :  { %8 = vsyncpa [#allocation3], 0  ;;  %s454_s12 = smov 0   ;;  %s504_s0 = inlined_call_operand.vmem [shape: f32[3], index: 0, kind: input, shape index: {}]   ;;  %s505_s1 = inlined_call_operand.vmem [shape: f32[2,1024], index: 1, kind: input, shape index: {}]   ;;  %s506_s2 = inlined_call_operand.vmem [shape: f32[2,1024], index: 2, kind: input, shape index: {}]   ;;  %s507_s3 = inlined_call_operand.vmem [shape: f32[2,2048], index: 3, kind: output, shape index: {}]  }
   0x1 LB: > { %s460_s13 = sadd.s32 4294967295, %s431_s12   ;;  %p365_p0 = scmp.ge.s32.totalorder %s431_s12, 1  ;;  %s431_s12 = sphi %s454_s12, %s14_s12  }
   0x2   : > { %p128_p1 = scmp.lt.s32.totalorder %s431_s12, 3  ;;  %s141_s16 = sshll.u32 %s504_s0, 4  ;;  %s142_s16 = int_to_ptr.vmem [resolvable:$true] %s141_s16 }
   0x3   : > { %p393_p3 = scmp.eq.s32.totalorder %s460_s13, 0  ;;  %s406_s18 = scalar_lea.vmem %s142_s16, 16 }
   0x4   : > { %p467_p2 = pnand %p365_p0, %p128_p1  ;;  %p407_p6 = scmp.ne.s32.totalorder %s142_s16, %s406_s18 }
   0x5   : > { %p414_p10 = scmp.lt.s32.totalorder %s142_s16, %s142_s16  ;;  %p415_p11 = scmp.lt.s32.totalorder %s406_s18, %s406_s18 }
   0x6   : > { %p389_p4 = pneg %p467_p2 }
   0x7   : > { %p416_p12 = por %p415_p11, %p414_p10 }
   0x8   : > { %p390_p5 = pnand %p393_p3, %p389_p4 }
   0xa   : > { %p408_p7 = pneg %p390_p5 }
   0xc   : > { %p409_p8 = pnand %p408_p7, %p407_p6 }
   0xe   : > { %p410_p9 = pneg %p409_p8 }
  0x10   : > { %p417_p13 = pnand %p416_p12, %p410_p9 }
  0x12   : > { %420 = shalt.err (!%p417_p13)
}
  0x13   : > { %s433_s19 = smov [#allocation2]   ;;  %182 = sbr.rel (%p467_p2) target bundleno = 129 (0x81), region = 32 }
  0x14   : > { %392 = dma.vmem_to_smem (!%p390_p5), %s142_s16, 16, %s433_s19, [#allocation3]  }
  0x18   : > { %426 = dma.done.wait (%p393_p3), [#allocation3], 16  }
  0x19   : > { %428 = vsyncadd (%p393_p3), [#allocation3], 4294967280 }
  0x1a   : > { %188 = sfence }
  0x1b   : > { %p217_p0 = scmp.lt.s32.totalorder %s460_s13, 0  ;;  %s372_s20 = sadd.s32 4294967295, %s460_s13 }
  0x1c   : > { %p228_p1 = scmp.gt.s32.totalorder %s372_s20, 0  ;;  %s375_s21 = sshll.u32 %s460_s13, 3 }
  0x1d   : > { %s218_s22 = scalar_select %p217_p0, %s460_s13, 0 }
  0x1e   : > { %s510_s20 = smov (!%p228_p1, %s372_s20), 0  ;;  %p240_p4 = scmp.lt.s32.totalorder %s375_s21, 15 }
  0x1f   : > { %s370_s23 = sshll.u32 %s218_s22, 3  ;;  %s373_s24 = sshll.u32 %s510_s20, 3 }
  0x20   : > { %p220_p2 = scmp.lt.s32.totalorder %s370_s23, 7  ;;  %p231_p5 = scmp.lt.s32.totalorder %s373_s24, 7 }
  0x21   : > { %s245_s25 = sld [smem:[#allocation2]]  ;;  %s516_s21 = smov (!%p240_p4, %s375_s21), 15 }
  0x22   : > { %s512_s23 = smov (!%p220_p2, %s370_s23), 7  ;;  %s514_s24 = smov (!%p231_p5, %s373_s24), 7 }
  0x23   : > { %s371_s26 = sshll.u32 %s512_s23, 1  ;;  %s486_s27 = sld [smem:[#allocation2 + $0x1]] }
  0x24   : > { %s223_s30 = scalar_lea.vmem %s505_s1, %s371_s26  ;;  %s374_s4 = sshll.u32 %s514_s24, 1 }
  0x25   : > { %s234_s7 = scalar_lea.vmem %s506_s2, %s374_s4  ;;  %s378_s8 = sld [smem:[#allocation2 + $0x2]] }
  0x26   : > { %s376_s9 = sshll.u32 %s516_s21, 1  ;;  %p379_p3 = scmp.ge.s32.totalorder %s460_s13, 1 }
  0x27   : > { %s243_s14 = scalar_lea.vmem %s507_s3, %s376_s9 }
  0x29   : > { %s247_s15 = sadd.f32 %s486_s27, %s245_s25 }
  0x2b   : > { %s249_s16 = sadd.f32 %s378_s8, %s247_s15 }
  0x2d   : > { %s250_s17 = sadd.f32 0.0001, %s249_s16 }
  0x2f   : > { %v251_v0 = vstv %s250_s17 }
  0x30   : > { %404 = vrcp.f32 %v251_v0 }
  0x3d   : > { %v405_v1 = vpop.eup %404 }
  0x3e   : > { %383 = vpush %v405_v1 }
  0x6d   : > { %262 = sbr.rel (%p379_p3) target bundleno = 118 (0x76), region = 40 }
  0x6f   : > { %s384_s18 = spop %383 }
  0x70   : > { %s254_s19 = smul.f32 %s384_s18, %s245_s25 }
  0x71   : > { %s258_s20 = smul.f32 %s384_s18, %s486_s27 }
  0x72   : > { %v263_v2 = vld [vmem:[%s223_s30] sm:$0xff]  ;;  %v265_v3 = vstv %s254_s19  ;;  %v264_v4 = vld [vmem:[%s223_s30 + $0x8] sm:$0xff] }
  0x73   : > { %v266_v5 = vmul.f32 %v265_v3, %v263_v2  ;;  %v267_v6 = vmul.f32 %v265_v3, %v264_v4 }
  0x75   : > { %268 = vst [vmem:[%s243_s14] sm:$0xff] %v266_v5  ;;  %269 = vst [vmem:[%s243_s14 + $0x8] sm:$0xff] %v267_v6 }
  0x76 PF: > { %p380_p6 = scmp.lt.s32.totalorder %s460_s13, 1 }
  0x78   : > { %273 = sbr.rel (%p380_p6) target bundleno = 129 (0x81), region = 44 }
  0x7d   : > { %v274_v7 = vld [vmem:[%s234_s7] sm:$0xff]  ;;  %v276_v8 = vstv %s258_s20  ;;  %v275_v9 = vld [vmem:[%s234_s7 + $0x8] sm:$0xff] }
  0x7e   : > { %v277_v10 = vmul.f32 %v276_v8, %v274_v7  ;;  %v278_v11 = vmul.f32 %v276_v8, %v275_v9 }
  0x80   : > { %279 = vst [vmem:[%s243_s14] sm:$0xff] %v277_v10  ;;  %280 = vst [vmem:[%s243_s14 + $0x8] sm:$0xff] %v278_v11 }
  0x81 PF: > { %s14_s12 = sadd.s32 1, %s431_s12  }
  0x82   : > { %p11_p7 = scmp.ge.s32.totalorder %s14_s12, 4  }
  0x84   :  { %13 = sbr.rel (!%p11_p7) target bundleno = 1 (0x1), region = 78 }
  0x89   :  { %303 = vsyncpa [#allocation3], 1 }
  0x8a   :  { %305 = vsyncpa [#allocation3 + $0x1], 1 }

</bundles_post_ra>
